<compile_context>
chip_gen: v6e
topology: v6e:2x2x1
jax: 0.10.0
libtpu: 0.0.40
codegen_flags: <defaults>
</compile_context>

<pallas_src>
import functools

import jax
import jax.numpy as jnp
from jax import lax
from jax.experimental import pallas as pl
from jax.experimental.pallas import tpu as pltpu

_LANE = 128
_SUBLANE = 8
_MAX_S_TILE_POOL = 4096    # pass 1 double-buffers only its input
_MAX_S_TILE_SCALE = 2048   # pass 2 double-buffers input + output


def _round_up(n, m):
    return ((n + m - 1) // m) * m


def _cdiv(a, b):
    return -(-a // b)


def _query_vmem_capacity_bytes():
    """Physical VMEM per core; conservative fallback if the query fails."""
    try:
        info = pltpu.get_tpu_info()
        cap = getattr(info, "vmem_capacity_bytes", None)
        if cap:
            return int(cap)
    except Exception:
        pass
    return 64 * 1024 * 1024           # v7x-sized fallback: safe everywhere


_VMEM_PHYS = _query_vmem_capacity_bytes()
# Scoped-VMEM limit handed to Mosaic (headroom left for internal scratch):
# ~96 MiB on v5e/v6e (128 MiB physical), ~48 MiB on v7x (64 MiB physical).
_VMEM_LIMIT = int(min(_VMEM_PHYS * 3 // 4, 96 * 1024 * 1024))
_PIPELINE_BUDGET = _VMEM_LIMIT - 4 * 1024 * 1024


def _pick_s_tile(c_rows, S, bytes_per_elem, max_tile, budget):
    """Largest spatial tile whose pipeline footprint fits `budget`.

    Returns S itself (single full-extent block, no masking needed) when it
    fits, else a multiple of 128 smaller than S, else 0 (=> tile channels).
    """
    per_lane = c_rows * bytes_per_elem
    max_lanes = (budget // per_lane) // _LANE * _LANE
    if max_lanes < _LANE:
        return 0
    if _round_up(S, _LANE) <= min(max_tile, max_lanes):
        return S
    return min(max_tile, max_lanes)


# ---------------------------------------------------------------------------
# Kernels
# ---------------------------------------------------------------------------

def _make_fused_kernel(C, inv_S, out_dtype):
    """Pool + FC gate + rescale on a VMEM-resident (1, C, S) slab."""

    def kernel(x_ref, w1_ref, w2_ref, o_ref):
        x = x_ref[...]                                              # (1, C, S)
        ssum = jnp.sum(x, axis=-1, keepdims=True, dtype=jnp.float32)
        mean = ssum.reshape(C, 1) * inv_S                           # (C, 1) f32
        w1 = w1_ref[...].astype(jnp.float32)                        # (Cr, C)
        w2 = w2_ref[...].astype(jnp.float32)                        # (C, Cr)
        h = jnp.maximum(
            jnp.dot(w1, mean, preferred_element_type=jnp.float32), 0.0)
        g = jnp.dot(w2, h, preferred_element_type=jnp.float32)      # (C, 1)
        gate = (1.0 / (1.0 + jnp.exp(-g))).astype(out_dtype)
        o_ref[...] = x * gate.reshape(1, C, 1)

    return kernel


def _make_pool_kernel(S, s_tile):
    """Tiled spatial sum into a resident (1, c, 1) f32 accumulator."""
    ragged = (S % s_tile) != 0

    def kernel(x_ref, sum_ref):
        s = pl.program_id(2)                  # spatial (reduction) axis

        @pl.when(s == 0)
        def _():
            sum_ref[...] = jnp.zeros_like(sum_ref)

        x = x_ref[...]
        if ragged:                            # zero the out-of-bounds tail
            pos = s * s_tile + lax.broadcasted_iota(jnp.int32, x.shape, 2)
            x = jnp.where(pos < S, x, jnp.zeros_like(x))
        sum_ref[...] += jnp.sum(x, axis=-1, keepdims=True, dtype=jnp.float32)

    return kernel


def _make_scale_gate_kernel(C, inv_S, gate_dtype):
    """Rescale pass with the FC gate computed in-kernel once per batch."""

    def kernel(sum_ref, w1_ref, w2_ref, x_ref, o_ref, gate_sc):
        @pl.when(pl.program_id(1) == 0)
        def _():
            mean = sum_ref[...].reshape(C, 1) * inv_S               # (C, 1) f32
            w1 = w1_ref[...].astype(jnp.float32)
            w2 = w2_ref[...].astype(jnp.float32)
            h = jnp.maximum(
                jnp.dot(w1, mean, preferred_element_type=jnp.float32), 0.0)
            g = jnp.dot(w2, h, preferred_element_type=jnp.float32)  # (C, 1)
            gate = 1.0 / (1.0 + jnp.exp(-g))
            gate_sc[...] = gate.reshape(1, C, 1).astype(gate_dtype)

        o_ref[...] = x_ref[...] * gate_sc[...]

    return kernel


def _scale_kernel(gate_ref, x_ref, o_ref):
    """Plain per-channel rescale (channel-tiled fallback path)."""
    o_ref[...] = x_ref[...] * gate_ref[...]


# ---------------------------------------------------------------------------
# Wrapper
# ---------------------------------------------------------------------------

@functools.partial(jax.jit, static_argnames=("s_tile", "c_tile",
                                              "force_two_pass"))
def se_layer(x, w1, w2, *, s_tile=None, c_tile=None, force_two_pass=False):
    """x: (B, C, D, H, W);  w1: (C//r, C);  w2: (C, C//r).  Bias-free SE."""
    B, C, D, H, W = x.shape
    S = D * H * W
    inv_S = 1.0 / float(S)
    itemsize = jnp.dtype(x.dtype).itemsize
    c_pad = _round_up(C, _SUBLANE)
    s_pad = _round_up(S, _LANE)
    w_bytes = 2 * (w1.size * w1.dtype.itemsize + w2.size * w2.dtype.itemsize)

    x3 = x.reshape(B, C, S)

    def cparams(sem):
        return pltpu.CompilerParams(dimension_semantics=sem,
                                    vmem_limit_bytes=_VMEM_LIMIT)

    # ------------------ Path A: fully fused single pass ------------------
    # Per-batch footprint: 2 input + 2 output pipeline buffers of the slab,
    # an f32 pooling temp for sub-f32 dtypes, the (tiny) weights, slack.
    fused_bytes = (4 * c_pad * s_pad * itemsize
                   + (c_pad * s_pad * 4 if itemsize < 4 else 0)
                   + w_bytes + (256 << 10))
    if (not force_two_pass and s_tile is None and c_tile is None
            and fused_bytes <= _PIPELINE_BUDGET):
        out = pl.pallas_call(
            _make_fused_kernel(C, inv_S, x.dtype),
            out_shape=jax.ShapeDtypeStruct((B, C, S), x.dtype),
            grid_spec=pltpu.PrefetchScalarGridSpec(
                num_scalar_prefetch=0,
                grid=(B,),
                in_specs=[
                    pl.BlockSpec((1, C, S), lambda b: (b, 0, 0)),
                    pl.BlockSpec(w1.shape, lambda b: (0, 0)),
                    pl.BlockSpec(w2.shape, lambda b: (0, 0)),
                ],
                out_specs=pl.BlockSpec((1, C, S), lambda b: (b, 0, 0)),
            ),
            compiler_params=cparams(("parallel",)),
        )(x3, w1, w2)
        return out.reshape(B, C, D, H, W)

    # ------------------ Two-pass paths: pick tilings ------------------
    # VMEM bytes per (channel-row, lane) element, counting pipeline buffers
    # and in-kernel temporaries.
    pool_bpe = 3 * itemsize + (4 if itemsize < 4 else 0)   # 2 in-bufs + temps
    scale_bpe = 5 * itemsize                               # 2 in + 2 out + temp

    if c_tile is None:
        if c_pad * _LANE * scale_bpe + w_bytes <= _PIPELINE_BUDGET:
            c_tile = C                                     # the common case
        else:                                              # extreme C only
            c_tile = max(_SUBLANE,
                         _PIPELINE_BUDGET // (512 * scale_bpe)
                         // _SUBLANE * _SUBLANE)
            c_tile = min(c_tile, C)
    elif c_tile >= C:
        c_tile = C
    elif c_tile % _SUBLANE != 0:
        raise ValueError("c_tile must be a multiple of 8")
    channel_tiled = c_tile != C
    ct_pad = _round_up(c_tile, _SUBLANE)
    n_c = _cdiv(C, c_tile)

    if s_tile is None:
        s_tile_pool = _pick_s_tile(ct_pad, S, pool_bpe,
                                   _MAX_S_TILE_POOL, _PIPELINE_BUDGET)
        s_tile_scale = _pick_s_tile(ct_pad, S, scale_bpe,
                                    _MAX_S_TILE_SCALE, _PIPELINE_BUDGET)
        if s_tile_pool == 0 or s_tile_scale == 0:
            raise ValueError("channel tile too large for the VMEM budget")
    else:
        if s_tile >= S:
            s_tile = S
        elif s_tile % _LANE != 0:
            raise ValueError("s_tile must be a multiple of 128 or >= D*H*W")
        s_tile_pool = s_tile_scale = s_tile
    n_s_pool = _cdiv(S, s_tile_pool)
    n_s_scale = _cdiv(S, s_tile_scale)

    # ---- Pass 1: tiled global-average-pool (sum accumulated in f32). ----
    # Grid covers the true spatial extent; the ragged tail of the last block
    # is zero-masked inside the kernel (no jnp.pad pass over x).
    pooled_sum = pl.pallas_call(
        _make_pool_kernel(S, s_tile_pool),
        out_shape=jax.ShapeDtypeStruct((B, C, 1), jnp.float32),
        grid_spec=pltpu.PrefetchScalarGridSpec(
            num_scalar_prefetch=0,
            grid=(B, n_c, n_s_pool),
            in_specs=[pl.BlockSpec((1, c_tile, s_tile_pool),
                                   lambda b, c, s: (b, c, s))],
            out_specs=pl.BlockSpec((1, c_tile, 1), lambda b, c, s: (b, c, 0)),
        ),
        compiler_params=cparams(("parallel", "parallel", "arbitrary")),
    )(x3)

    if not channel_tiled:
        # ---- Pass 2 (path B): rescale; FC gate computed in-kernel once per
        # batch into a VMEM scratch (no extra dispatches / HBM round-trip).
        # The last partial spatial block is clipped by Pallas on writeback.
        out = pl.pallas_call(
            _make_scale_gate_kernel(C, inv_S, x.dtype),
            out_shape=jax.ShapeDtypeStruct((B, C, S), x.dtype),
            grid_spec=pltpu.PrefetchScalarGridSpec(
                num_scalar_prefetch=0,
                grid=(B, n_s_scale),
                in_specs=[
                    pl.BlockSpec((1, C, 1), lambda b, s: (b, 0, 0)),
                    pl.BlockSpec(w1.shape, lambda b, s: (0, 0)),
                    pl.BlockSpec(w2.shape, lambda b, s: (0, 0)),
                    pl.BlockSpec((1, C, s_tile_scale),
                                 lambda b, s: (b, 0, s)),
                ],
                out_specs=pl.BlockSpec((1, C, s_tile_scale),
                                       lambda b, s: (b, 0, s)),
                scratch_shapes=[pltpu.VMEM((1, C, 1), x.dtype)],
            ),
            compiler_params=cparams(("parallel", "arbitrary")),
        )(pooled_sum, w1, w2, x3)
    else:
        # ---- Path C: channel-tiled fallback. The gate needs all channels,
        # so it is computed on the tiny (B, C) tensor in plain JAX.
        mean = pooled_sum[..., 0] * inv_S                           # (B, C)
        h = jnp.maximum(
            jnp.dot(mean, w1.T, preferred_element_type=jnp.float32), 0.0)
        gate = jax.nn.sigmoid(
            jnp.dot(h, w2.T, preferred_element_type=jnp.float32))
        gate = gate.astype(x.dtype).reshape(B, C, 1)
        out = pl.pallas_call(
            _scale_kernel,
            out_shape=jax.ShapeDtypeStruct((B, C, S), x.dtype),
            grid_spec=pltpu.PrefetchScalarGridSpec(
                num_scalar_prefetch=0,
                grid=(B, n_c, n_s_scale),
                in_specs=[
                    pl.BlockSpec((1, c_tile, 1), lambda b, c, s: (b, c, 0)),
                    pl.BlockSpec((1, c_tile, s_tile_scale),
                                 lambda b, c, s: (b, c, s)),
                ],
                out_specs=pl.BlockSpec((1, c_tile, s_tile_scale),
                                       lambda b, c, s: (b, c, s)),
            ),
            compiler_params=cparams(("parallel", "parallel", "arbitrary")),
        )(gate, x3)

    return out.reshape(B, C, D, H, W)


def se_layer_ref(x, w1, w2):
    """Pure-JAX reference mirroring the PyTorch forward."""
    y = jnp.mean(x, axis=(2, 3, 4))                    # (B, C)
    y = jnp.maximum(y @ w1.T, 0.0)                     # (B, C//r)
    y = jax.nn.sigmoid(y @ w2.T)                       # (B, C)
    return x * y[:, :, None, None, None]


if __name__ == "__main__":
    key = jax.random.PRNGKey(0)
    kx, k1, k2, kx2 = jax.random.split(key, 4)

    B, C = 2, 32
    reduction = 8
    hidden = C // reduction                 # 4
    D, H, W = 4, 8, 8                       # S = 256

    x = jax.random.normal(kx, (B, C, D, H, W), dtype=jnp.float32)
    # Linear weights: (out_features, in_features), bias-free.
    w1 = jax.random.normal(k1, (hidden, C), dtype=jnp.float32) * (1.0 / C ** 0.5)
    w2 = jax.random.normal(k2, (C, hidden), dtype=jnp.float32) * (1.0 / hidden ** 0.5)

    tol = dict(atol=1e-4, rtol=1e-4)

    # Path A: fused single pass (default for this size).
    ref = se_layer_ref(x, w1, w2)
    out = jax.block_until_ready(se_layer(x, w1, w2))
    assert out.shape == x.shape
    assert jnp.allclose(out, ref, **tol), "fused path mismatch"

    # Ragged spatial extent (S = 3*7*13 = 273, not a multiple of 128).
    x_odd = jax.random.normal(kx2, (B, C, 3, 7, 13), dtype=jnp.float32)
    ref_odd = se_layer_ref(x_odd, w1, w2)

    # Default config on the ragged shape (still the fused path).
    out_odd = jax.block_until_ready(se_layer(x_odd, w1, w2))
    assert jnp.allclose(out_odd, ref_odd, **tol), "ragged fused mismatch"

    # Path B: two-pass, gate folded into the rescale kernel; the forced
    # 128-lane tile exercises the multi-block reduction and tail masking.
    out_2p = jax.block_until_ready(
        se_layer(x_odd, w1, w2, s_tile=128, force_two_pass=True))
    assert jnp.allclose(out_2p, ref_odd, **tol), "two-pass mismatch"

    # Path C: channel-tiled fallback (only auto-selected for huge C).
    out_ct = jax.block_until_ready(
        se_layer(x_odd, w1, w2, s_tile=128, c_tile=16, force_two_pass=True))
    assert jnp.allclose(out_ct, ref_odd, **tol), "channel-tiled mismatch"

    print("KERNEL_OK")
</pallas_src>

<mosaic_0001>
module attributes {stable_mosaic.version = 11 : i64} {
  func.func @kernel(%arg0: i32, %arg1: memref<1x32x256xf32, #tpu.memory_space<vmem>>, %arg2: memref<4x32xf32, #tpu.memory_space<vmem>>, %arg3: memref<32x4xf32, #tpu.memory_space<vmem>>, %arg4: memref<1x32x256xf32, #tpu.memory_space<vmem>>) attributes {dimension_semantics = [#tpu.dimension_semantics<parallel>], iteration_bounds = array<i64: 2>, scalar_prefetch = 0 : i64, scratch_operands = 0 : i64, tpu.core_type = #tpu.core_type<tc>, window_params = [{transform_indices = @transform_0, window_bounds = array<i64: 1, 32, 256>}, {pipeline_mode = #tpu.pipeline_mode<synchronous>, transform_indices = @transform_1, window_bounds = array<i64: 4, 32>}, {pipeline_mode = #tpu.pipeline_mode<synchronous>, transform_indices = @transform_2, window_bounds = array<i64: 32, 4>}, {transform_indices = @transform_3, window_bounds = array<i64: 1, 32, 256>}]} {
    %c0 = arith.constant 0 : index
    %c0_0 = arith.constant 0 : index
    %c0_1 = arith.constant 0 : index
    %0 = vector.load %arg1[%c0, %c0_0, %c0_1] : memref<1x32x256xf32, #tpu.memory_space<vmem>>, vector<1x32x256xf32>
    %cst = arith.constant dense<0.000000e+00> : vector<1x32xf32>
    %1 = vector.multi_reduction <add>, %0, %cst [2] : vector<1x32x256xf32> to vector<1x32xf32>
    %2 = vector.shape_cast %1 : vector<1x32xf32> to vector<1x32x1xf32>
    %3 = vector.shape_cast %2 : vector<1x32x1xf32> to vector<32x1xf32>
    %cst_2 = arith.constant 3.906250e-03 : f32
    %4 = vector.broadcast %cst_2 : f32 to vector<32x1xf32>
    %5 = arith.mulf %3, %4 : vector<32x1xf32>
    %c0_3 = arith.constant 0 : index
    %c0_4 = arith.constant 0 : index
    %6 = vector.load %arg2[%c0_3, %c0_4] : memref<4x32xf32, #tpu.memory_space<vmem>>, vector<4x32xf32>
    %c0_5 = arith.constant 0 : index
    %c0_6 = arith.constant 0 : index
    %7 = vector.load %arg3[%c0_5, %c0_6] : memref<32x4xf32, #tpu.memory_space<vmem>>, vector<32x4xf32>
    %cst_7 = arith.constant dense<0.000000e+00> : vector<4x1xf32>
    %8 = tpu.matmul %6, %5, %cst_7 {dimension_numbers = #tpu.dot_dimension_numbers<[1], [0], [0], [1], [0, 0, 1, 1], [], []>} : vector<4x32xf32>, vector<32x1xf32>, vector<4x1xf32> -> vector<4x1xf32>
    %cst_8 = arith.constant 0.000000e+00 : f32
    %9 = vector.broadcast %cst_8 : f32 to vector<4x1xf32>
    %10 = arith.maximumf %8, %9 : vector<4x1xf32>
    %cst_9 = arith.constant dense<0.000000e+00> : vector<32x1xf32>
    %11 = tpu.matmul %7, %10, %cst_9 {dimension_numbers = #tpu.dot_dimension_numbers<[1], [0], [0], [1], [0, 0, 1, 1], [], []>} : vector<32x4xf32>, vector<4x1xf32>, vector<32x1xf32> -> vector<32x1xf32>
    %cst_10 = arith.constant 0.000000e+00 : f32
    %12 = vector.broadcast %cst_10 : f32 to vector<32x1xf32>
    %13 = arith.subf %12, %11 : vector<32x1xf32>
    %14 = math.exp %13 : vector<32x1xf32>
    %cst_11 = arith.constant 1.000000e+00 : f32
    %15 = vector.broadcast %cst_11 : f32 to vector<32x1xf32>
    %16 = arith.addf %15, %14 : vector<32x1xf32>
    %cst_12 = arith.constant 1.000000e+00 : f32
    %17 = vector.broadcast %cst_12 : f32 to vector<32x1xf32>
    %18 = arith.divf %17, %16 : vector<32x1xf32>
    %19 = vector.shape_cast %18 : vector<32x1xf32> to vector<1x32x1xf32>
    %20 = vector.broadcast %19 : vector<1x32x1xf32> to vector<1x32x256xf32>
    %21 = arith.mulf %0, %20 : vector<1x32x256xf32>
    %c0_13 = arith.constant 0 : index
    %c0_14 = arith.constant 0 : index
    %c0_15 = arith.constant 0 : index
    %22 = vector.load %arg4[%c0_13, %c0_14, %c0_15] : memref<1x32x256xf32, #tpu.memory_space<vmem>>, vector<1x32x256xf32>
    tpu.vector_store %arg4[%c0_13, %c0_14, %c0_15], %21 {strides = array<i32>} : memref<1x32x256xf32, #tpu.memory_space<vmem>>, vector<1x32x256xf32>,
    return
  }
  func.func @transform_0(%arg0: i32) -> (i32, i32, i32) {
    %c0_i32 = arith.constant 0 : i32
    %c0_i32_0 = arith.constant 0 : i32
    %c0_i32_1 = arith.constant 0 : i32
    return %arg0, %c0_i32, %c0_i32_0 : i32, i32, i32
  }
  func.func @transform_1(%arg0: i32) -> (i32, i32) {
    %c0_i32 = arith.constant 0 : i32
    %c0_i32_0 = arith.constant 0 : i32
    %c0_i32_1 = arith.constant 0 : i32
    return %c0_i32, %c0_i32_0 : i32, i32
  }
  func.func @transform_2(%arg0: i32) -> (i32, i32) {
    %c0_i32 = arith.constant 0 : i32
    %c0_i32_0 = arith.constant 0 : i32
    %c0_i32_1 = arith.constant 0 : i32
    return %c0_i32, %c0_i32_0 : i32, i32
  }
  func.func @transform_3(%arg0: i32) -> (i32, i32, i32) {
    %c0_i32 = arith.constant 0 : i32
    %c0_i32_0 = arith.constant 0 : i32
    %c0_i32_1 = arith.constant 0 : i32
    return %arg0, %c0_i32, %c0_i32_0 : i32, i32, i32
  }
}

</mosaic_0001>

<bundles_post_ra>
// kernel: se_layer.1
= control target key start
LH: loop header
LB: loop body
LE: loop exit
PB: predicated region body
PF: predicated region fallthrough
CT: control target
= control target key end

     0   :  { %s600_s12 = smov 0   ;;  %s671_s0 = inlined_call_operand.vmem [shape: f32[2,32,256], index: 0, kind: input, shape index: {}]   ;;  %s672_s1 = inlined_call_operand.vmem [shape: f32[4,32], index: 1, kind: input, shape index: {}]   ;;  %s673_s2 = inlined_call_operand.vmem [shape: f32[32,4], index: 2, kind: input, shape index: {}]   ;;  %s674_s3 = inlined_call_operand.vmem [shape: f32[2,32,256], index: 3, kind: output, shape index: {}]  }
   0x1 LB: > { %s492_s13 = sadd.s32 4294967295, %s575_s12   ;;  %p496_p0 = scmp.ge.s32.totalorder %s575_s12, 1  ;;  %s575_s12 = sphi %s600_s12, %s13_s12  }
   0x2   : > { %p137_p1 = scmp.lt.s32.totalorder %s575_s12, 3 }
   0x4   : > { %p138_p2 = pnand %p496_p0, %p137_p1 }
   0x5   : > { %p161_p3 = scmp.lt.s32.totalorder (!%p138_p2), %s492_s13, 1 }
   0x6   : > { %141 = sbr.rel (%p138_p2) target bundleno = 727 (0x2d7), region = 32 }
   0xb   : > { %s676_s13 = smov (!%p161_p3, %s492_s13), 1  ;;  %v577_v12 = vmov 0.0   ;;  %vm578_vm0 = vmmov 0   ;;  %v195_v21 = vld [vmem:[%s672_s1] sm:$0xf]  ;;  %vm200_vm1 = vcmask 261120  }
   0xc   : > { %s509_s14 = sshll.u32 %s676_s13, 6  ;;  %521 = vmatprep.subr.mxu0 %v577_v12  ;;  %529 = vmatprep.mubr.msk.f32.mxu0 %vm578_vm0, %v577_v12  ;;  %v196_v22 = vld [vmem:[%s673_s2] sm:$0xff]  ;;  %vm275_vm2 = vcmask 31744   ;;  %vm288_vm3 = vcmask 1043456   ;;  %v197_v26 = vld [vmem:[%s673_s2 + $0x8] sm:$0xff]  ;;  %v198_v27 = vld [vmem:[%s673_s2 + $0x10] sm:$0xff] }
   0xd   : > { %s165_s17 = scalar_lea.vmem %s671_s0, %s509_s14  ;;  %534 = vmatprep.mubr.msk.f32.mxu1 %vm275_vm2, %v196_v22  ;;  %v199_v28 = vld [vmem:[%s673_s2 + $0x18] sm:$0xff]  ;;  %v579_v29 = vmov 0   ;;  %s170_s30 = scalar_lea.vmem %s674_s3, %s509_s14 }
   0xe   : > { %v616_v0 = vld [vmem:[%s165_s17 + $0x30] sm:$0xff]  ;;  %v618_v1 = vld [vmem:[%s165_s17 + $0x38] sm:$0xff]  ;;  %v620_v2 = vld [vmem:[%s165_s17 + $0x20] sm:$0xff]  ;;  %552 = vset.pattern.permute.xlu1 %v579_v29  ;;  %551 = vset.pattern.permute.xlu0 %v579_v29 }
   0xf   : > { %v188_v3 = vadd.f32 %v618_v1, %v616_v0  ;;  %v624_v4 = vld [vmem:[%s165_s17 + $0x28] sm:$0xff]  ;;  %v626_v5 = vld [vmem:[%s165_s17 + $0x10] sm:$0xff]  ;;  %v628_v6 = vld [vmem:[%s165_s17 + $0x18] sm:$0xff] }
  0x10   : > { %v182_v7 = vadd.f32 %v628_v6, %v626_v5  ;;  %v632_v8 = vld [vmem:[%s165_s17] sm:$0xff]  ;;  %v634_v9 = vld [vmem:[%s165_s17 + $0x8] sm:$0xff]  ;;  %v185_v10 = vadd.f32 %v624_v4, %v620_v2 }
  0x11   : > { %189 = vadd.xlane.f32.xlu0 %v188_v3  ;;  %v179_v11 = vadd.f32 %v634_v9, %v632_v8 }
  0x12   : > { %183 = vadd.xlane.f32.xlu1 %v182_v7 }
  0x15   : > { %186 = vadd.xlane.f32.xlu0 %v185_v10 }
  0x16   : > { %180 = vadd.xlane.f32.xlu1 %v179_v11 }
  0x9a   : > { %v190_v13 = vpop.xlane.xlu0 %189 }
  0x9b   : > { %v194_v14 = vmul.f32 0.00390625, %v190_v13  ;;  %v184_v15 = vpop.xlane.xlu1 %183 }
  0x9c   : > { %v192_v19 = vmul.f32 0.00390625, %v184_v15 }
  0x9d   : > { %522 = vmatpush3.msra.mxu0 %v194_v14 }
  0x9e   : > { %v187_v16 = vpop.xlane.xlu0 %186  ;;  %523 = vmatprep.subr.mxu0 %v577_v12 }
  0x9f   : > { %v193_v17 = vmul.f32 0.00390625, %v187_v16  ;;  %v181_v18 = vpop.xlane.xlu1 %180 }
  0xa0   : > { %v191_v20 = vmul.f32 0.00390625, %v181_v18 }
  0xa1   : > { %524 = vmatpush3.msra.mxu0 %v193_v17 }
  0xa2   : > { %525 = vmatprep.subr.mxu0 %v577_v12 }
  0xa3   : > { %526 = vmatpush3.msra.mxu0 %v192_v19 }
  0xa4   : > { %527 = vmatprep.subr.mxu0 %v577_v12 }
  0xa5   : > { %528 = vmatpush3.msra.mxu0 %v191_v20 }
  0xa6   : > { %530 = vmatmul.mubr.msk.f32.vlgmr.msra.gmra.mxu0 %vm200_vm1, %v195_v21 }
 0x166   : > { %v270_v23 = vpop.f32.mrf.mxu0 }
 0x167   : > { %v274_v24 = vmax.f32 %v270_v23, 0.0 }
 0x168   : > { %v531_v25 = vpop.f32.mrf.mxu0 }
 0x169   : > { %532 = vmatprep.subr.msk.mxu1 %vm288_vm3, %v274_v24 }
 0x16a   : > { %533 = vmatpush3.msk.msra.mxu1 %vm288_vm3, %v274_v24 }
 0x16b   : > { %535 = vmatmul.mubr.msk.f32.vlgmr.msra.gmra.mxu1 %vm275_vm2, %v197_v26 }
 0x16c   : > { %537 = vmatprep.mubr.msk.f32.mxu1 %vm275_vm2, %v198_v27 }
 0x16f   : > { %538 = vmatmul.mubr.msk.f32.gmra.mxu1 %vm275_vm2, %v199_v28 }
 0x22b   : > { %v536_v30 = vpop.f32.mrf.mxu1 }
 0x22c   : > { %v378_v31 = vsub.f32 0.0, %v536_v30 }
 0x22d   : > { %v358_v32 = vpop.f32.mrf.mxu1 }
 0x22e   : > { %v383_v33 = vmul.f32 1.442695, %v378_v31  ;;  %v377_v34 = vsub.f32 0.0, %v358_v32 }
 0x22f   : > { %v539_v35 = vpop.f32.mrf.mxu1 }
 0x230   : > { %553 = vpow2.f32 %v383_v33  ;;  %v381_v36 = vmul.f32 1.442695, %v377_v34  ;;  %v380_v37 = vsub.f32 0.0, %v539_v35 }
 0x231   : > { %v368_v38 = vpop.f32.mrf.mxu1 }
 0x232   : > { %555 = vpow2.f32 %v381_v36  ;;  %v387_v39 = vmul.f32 1.442695, %v380_v37  ;;  %v379_v40 = vsub.f32 0.0, %v368_v38 }
 0x234   : > { %v385_v41 = vmul.f32 1.442695, %v379_v40  ;;  %557 = vpow2.f32 %v387_v39 }
 0x236   : > { %559 = vpow2.f32 %v385_v41 }
 0x23d   : > { %v554_v42 = vpop.eup %553 }
 0x23e   : > { %v390_v43 = vadd.f32 1.0, %v554_v42 }
 0x23f   : > { %v556_v44 = vpop.eup %555 }
 0x240   : > { %561 = vrcp.f32 %v390_v43  ;;  %v389_v45 = vadd.f32 1.0, %v556_v44 }
 0x241   : > { %v558_v46 = vpop.eup %557 }
 0x242   : > { %563 = vrcp.f32 %v389_v45  ;;  %v392_v49 = vadd.f32 1.0, %v558_v46 }
 0x243   : > { %v560_v47 = vpop.eup %559 }
 0x244   : > { %v391_v48 = vadd.f32 1.0, %v560_v47 }
 0x246   : > { %565 = vrcp.f32 %v391_v48 }
 0x247   : > { %567 = vrcp.f32 %v392_v49 }
 0x24d   : > { %v562_v50 = vpop.eup %561 }
 0x24e   : > { %408 = vperm.xlu1 %552, %v562_v50  }
 0x24f   : > { %v564_v51 = vpop.eup %563 }
 0x250   : > { %403 = vperm.xlu0 %551, %v564_v51  }
 0x253   : > { %v566_v52 = vpop.eup %565 }
 0x254   : > { %413 = vperm.xlu1 %552, %v566_v52   ;;  %v568_v53 = vpop.eup %567 }
 0x258   : > { %418 = vperm.xlu1 %552, %v568_v53  }
 0x2c9   : > { %v409_v54 = vpop.permute.xlu1 %408 }
 0x2ca   : > { %v423_v55 = vmul.f32 %v409_v54, %v626_v5  ;;  %v424_v56 = vmul.f32 %v409_v54, %v628_v6 }
 0x2cb   : > { %v404_v57 = vpop.permute.xlu0 %403 }
 0x2cc   : > { %431 = vst [vmem:[%s170_s30 + $0x10] sm:$0xff] %v423_v55  ;;  %432 = vst [vmem:[%s170_s30 + $0x18] sm:$0xff] %v424_v56  ;;  %v421_v58 = vmul.f32 %v404_v57, %v632_v8  ;;  %v422_v59 = vmul.f32 %v404_v57, %v634_v9 }
 0x2ce   : > { %429 = vst [vmem:[%s170_s30] sm:$0xff] %v421_v58  ;;  %430 = vst [vmem:[%s170_s30 + $0x8] sm:$0xff] %v422_v59 }
 0x2cf   : > { %v414_v60 = vpop.permute.xlu1 %413 }
 0x2d0   : > { %v425_v61 = vmul.f32 %v414_v60, %v620_v2  ;;  %v426_v62 = vmul.f32 %v414_v60, %v624_v4 }
 0x2d2   : > { %433 = vst [vmem:[%s170_s30 + $0x20] sm:$0xff] %v425_v61  ;;  %434 = vst [vmem:[%s170_s30 + $0x28] sm:$0xff] %v426_v62 }
 0x2d3   : > { %v419_v63 = vpop.permute.xlu1 %418 }
 0x2d4   : > { %v427_v3 = vmul.f32 %v419_v63, %v616_v0  ;;  %v428_v5 = vmul.f32 %v419_v63, %v618_v1 }
 0x2d6   : > { %435 = vst [vmem:[%s170_s30 + $0x30] sm:$0xff] %v427_v3  ;;  %436 = vst [vmem:[%s170_s30 + $0x38] sm:$0xff] %v428_v5 }
 0x2d7 PF: > { %s13_s12 = sadd.s32 1, %s575_s12  }
 0x2d8   : > { %p10_p4 = scmp.ge.s32.totalorder %s13_s12, 4  }
 0x2da   :  { %12 = sbr.rel (!%p10_p4) target bundleno = 1 (0x1), region = 62 }

</bundles_post_ra>
